<compile_context>
chip_gen: v5e
topology: v5e:2x2
jax: 0.10.0
libtpu: 0.0.40
codegen_flags: <defaults>
</compile_context>

<pallas_src>
import functools

import jax
import jax.numpy as jnp
from jax.experimental import pallas as pl
from jax.experimental.pallas import tpu as pltpu


STATE_DIM = 4
HIDDEN = 100
ACTION_N = 2

# Only the hidden axis is padded to a lane-dense width; state (K=4) and action
# (N=2) dims keep their natural size (block dims equal to the full array extent
# satisfy the (8,128) rule) so HBM input/output traffic stays un-inflated.
H_PAD = 128


def _round_up(n: int, m: int) -> int:
    return ((n + m - 1) // m) * m


def cem_forward_kernel(x_ref, w1_ref, b1_ref, w2_ref, b2_ref, out_ref, *, compute_dtype):
    """x: [tb, 4], w1: [4, 128], b1: [1, 128] (f32), w2: [128, 2], b2: [1, 2] (f32),
       out: [tb, 2] (f32)."""
    x = x_ref[...].astype(compute_dtype)          # no-op for the f32 path

    # Linear(4, 100) + ReLU  (hidden lanes 100..127 are zero-weight -> relu(0)=0)
    h = jnp.dot(x, w1_ref[...], preferred_element_type=jnp.float32) + b1_ref[...]
    h = jnp.maximum(h, 0.0)

    # Linear(100, 2)  (zero rows 100..127 of w2 contribute nothing)
    out = jnp.dot(h.astype(compute_dtype), w2_ref[...],
                  preferred_element_type=jnp.float32) + b2_ref[...]
    out_ref[...] = out.astype(out_ref.dtype)

    # TODO(synk): the get_action path could fuse softmax + eps-greedy mixing here
    # so only a [tb, 2] prob (or [tb] action) array ever leaves VMEM.


def cem_forward_pallas(x, w1, b1, w2, b2, *, block_b=2048):
    """x: [B, STATE_DIM] float32.  Params from init_params.  Returns [B, ACTION_N] f32."""
    B = x.shape[0]

    if B < 8:
        # Block dims equal the full array dims -> always legal, single grid step.
        tb = B
    else:
        tb = min(block_b, _round_up(B, 8))
        # Keep >= 2 grid steps so the "parallel" batch axis can use both v7x TCs.
        if B > 8 and pl.cdiv(B, tb) < 2:
            tb = _round_up(pl.cdiv(B, 2), 8)

    grid = (pl.cdiv(B, tb),)
    kernel = functools.partial(cem_forward_kernel, compute_dtype=w1.dtype)

    grid_spec = pltpu.PrefetchScalarGridSpec(
        num_scalar_prefetch=0,
        grid=grid,
        in_specs=[
            pl.BlockSpec((tb, STATE_DIM), lambda i: (i, 0)),      # x: tiled over batch
            pl.BlockSpec((STATE_DIM, H_PAD), lambda i: (0, 0)),   # weights: VMEM-resident
            pl.BlockSpec((1, H_PAD), lambda i: (0, 0)),
            pl.BlockSpec((H_PAD, ACTION_N), lambda i: (0, 0)),
            pl.BlockSpec((1, ACTION_N), lambda i: (0, 0)),
        ],
        out_specs=pl.BlockSpec((tb, ACTION_N), lambda i: (i, 0)),  # narrow output, no padding
    )

    return pl.pallas_call(
        kernel,
        out_shape=jax.ShapeDtypeStruct((B, ACTION_N), jnp.float32),
        grid_spec=grid_spec,
        compiler_params=pltpu.CompilerParams(
            dimension_semantics=("parallel",),   # shards batch tiles across TCs on v7x
        ),
    )(x, w1, b1, w2, b2)


def _cem_forward_jnp(x, w1, b1, w2, b2):
    """Plain-XLA fallback for tiny batches (pallas_call launch overhead dominates)."""
    cd = w1.dtype
    h = jnp.maximum(
        jnp.dot(x.astype(cd), w1, preferred_element_type=jnp.float32) + b1, 0.0)
    return jnp.dot(h.astype(cd), w2, preferred_element_type=jnp.float32) + b2


def cem_forward(x, params, *, block_b=2048, min_pallas_batch=64):
    w1, b1, w2, b2 = params
    if x.shape[0] < min_pallas_batch:
        return _cem_forward_jnp(x, w1, b1, w2, b2)
    return cem_forward_pallas(x, w1, b1, w2, b2, block_b=block_b)


def init_params(key, dtype=jnp.float32):
    """nn.Linear-style uniform(-1/sqrt(fan_in), 1/sqrt(fan_in)) init, stored
    pre-transposed as [in, out].  Weights are stored directly in `dtype`
    (use jnp.bfloat16 on v6e/v7x; keep float32 on v5e); biases stay float32.
    Only the hidden axis is zero-padded to 128."""
    k1, k2, k3, k4 = jax.random.split(key, 4)
    lim1 = 1.0 / float(STATE_DIM) ** 0.5
    lim2 = 1.0 / float(HIDDEN) ** 0.5

    w1_raw = jax.random.uniform(k1, (STATE_DIM, HIDDEN), jnp.float32, -lim1, lim1)
    b1_raw = jax.random.uniform(k2, (1, HIDDEN), jnp.float32, -lim1, lim1)
    w2_raw = jax.random.uniform(k3, (HIDDEN, ACTION_N), jnp.float32, -lim2, lim2)
    b2_raw = jax.random.uniform(k4, (1, ACTION_N), jnp.float32, -lim2, lim2)

    # Zero-padding of the hidden axis guarantees padded lanes contribute exactly 0.
    w1 = jnp.zeros((STATE_DIM, H_PAD), dtype).at[:, :HIDDEN].set(w1_raw.astype(dtype))
    b1 = jnp.zeros((1, H_PAD), jnp.float32).at[:, :HIDDEN].set(b1_raw)
    w2 = jnp.zeros((H_PAD, ACTION_N), dtype).at[:HIDDEN, :].set(w2_raw.astype(dtype))
    b2 = b2_raw  # (1, ACTION_N), float32
    return (w1, b1, w2, b2), (w1_raw, b1_raw, w2_raw, b2_raw)


def _reference(x, raw_params):
    w1, b1, w2, b2 = raw_params
    return jnp.maximum(x @ w1 + b1, 0.0) @ w2 + b2


if __name__ == "__main__":
    key = jax.random.PRNGKey(0)
    k_small, k_big, k_param = jax.random.split(key, 3)

    params_f32, raw_params = init_params(k_param, dtype=jnp.float32)

    # --- small batch (matches get_action usage) ------------------------------
    batch = 2
    x_small = jax.random.normal(k_small, (batch, STATE_DIM), jnp.float32)
    ref_small = _reference(x_small, raw_params)

    # forced through the Pallas kernel (single full-extent block)
    logits_small = cem_forward_pallas(x_small, *params_f32)
    jax.block_until_ready(logits_small)
    assert logits_small.shape == (batch, ACTION_N)
    assert jnp.allclose(logits_small, ref_small, atol=1e-5, rtol=1e-5), "f32 small-batch mismatch"

    # dispatcher routes tiny batches to the plain-jnp fallback
    logits_small_d = cem_forward(x_small, params_f32)
    jax.block_until_ready(logits_small_d)
    assert jnp.allclose(logits_small_d, ref_small, atol=1e-5, rtol=1e-5), "fallback mismatch"

    # --- large batch (update_policy-style many states), exercises batch grid --
    big_batch = 1000
    x_big = jax.random.normal(k_big, (big_batch, STATE_DIM), jnp.float32)
    ref_big = _reference(x_big, raw_params)

    logits_big = cem_forward(x_big, params_f32)      # Pallas path, 2 grid steps
    jax.block_until_ready(logits_big)
    assert logits_big.shape == (big_batch, ACTION_N)
    assert jnp.allclose(logits_big, ref_big, atol=1e-4, rtol=1e-4), "f32 big-batch mismatch"

    # --- bf16 weight path (v6e/v7x MXU, f32 accumulation), relaxed tolerance --
    params_bf16, _ = init_params(k_param, dtype=jnp.bfloat16)
    logits_bf16 = cem_forward(x_big, params_bf16)
    jax.block_until_ready(logits_bf16)
    assert jnp.allclose(logits_bf16, ref_big, atol=5e-2, rtol=5e-2), "bf16 mismatch"

    # TODO(synk): softmax + eps-greedy action sampling, Adam/LR-scheduler and
    # CrossEntropyLoss from the PyTorch module are training/host-side logic and
    # are intentionally not part of this forward-pass kernel.

    print("KERNEL_OK")
</pallas_src>

<mosaic_0001>
module attributes {stable_mosaic.version = 11 : i64} {
  func.func @cem_forward_kernel(%arg0: i32, %arg1: memref<2x4xf32, #tpu.memory_space<vmem>>, %arg2: memref<4x128xf32, #tpu.memory_space<vmem>>, %arg3: memref<1x128xf32, #tpu.memory_space<vmem>>, %arg4: memref<128x2xf32, #tpu.memory_space<vmem>>, %arg5: memref<1x2xf32, #tpu.memory_space<vmem>>, %arg6: memref<2x2xf32, #tpu.memory_space<vmem>>) attributes {dimension_semantics = [#tpu.dimension_semantics<parallel>], iteration_bounds = array<i64: 1>, scalar_prefetch = 0 : i64, scratch_operands = 0 : i64, tpu.core_type = #tpu.core_type<tc>, window_params = [{transform_indices = @transform_0, window_bounds = array<i64: 2, 4>}, {pipeline_mode = #tpu.pipeline_mode<synchronous>, transform_indices = @transform_1, window_bounds = array<i64: 4, 128>}, {pipeline_mode = #tpu.pipeline_mode<synchronous>, transform_indices = @transform_2, window_bounds = array<i64: 1, 128>}, {pipeline_mode = #tpu.pipeline_mode<synchronous>, transform_indices = @transform_3, window_bounds = array<i64: 128, 2>}, {pipeline_mode = #tpu.pipeline_mode<synchronous>, transform_indices = @transform_4, window_bounds = array<i64: 1, 2>}, {transform_indices = @transform_5, window_bounds = array<i64: 2, 2>}]} {
    %c0 = arith.constant 0 : index
    %c0_0 = arith.constant 0 : index
    %0 = vector.load %arg1[%c0, %c0_0] : memref<2x4xf32, #tpu.memory_space<vmem>>, vector<2x4xf32>
    %c0_1 = arith.constant 0 : index
    %c0_2 = arith.constant 0 : index
    %1 = vector.load %arg2[%c0_1, %c0_2] : memref<4x128xf32, #tpu.memory_space<vmem>>, vector<4x128xf32>
    %cst = arith.constant dense<0.000000e+00> : vector<2x128xf32>
    %2 = tpu.matmul %0, %1, %cst {dimension_numbers = #tpu.dot_dimension_numbers<[1], [0], [0], [1], [0, 0, 1, 1], [], []>} : vector<2x4xf32>, vector<4x128xf32>, vector<2x128xf32> -> vector<2x128xf32>
    %c0_3 = arith.constant 0 : index
    %c0_4 = arith.constant 0 : index
    %3 = vector.load %arg3[%c0_3, %c0_4] : memref<1x128xf32, #tpu.memory_space<vmem>>, vector<1x128xf32>
    %4 = vector.broadcast %3 : vector<1x128xf32> to vector<2x128xf32>
    %5 = arith.addf %2, %4 : vector<2x128xf32>
    %cst_5 = arith.constant 0.000000e+00 : f32
    %6 = vector.broadcast %cst_5 : f32 to vector<2x128xf32>
    %7 = arith.maximumf %5, %6 : vector<2x128xf32>
    %c0_6 = arith.constant 0 : index
    %c0_7 = arith.constant 0 : index
    %8 = vector.load %arg4[%c0_6, %c0_7] : memref<128x2xf32, #tpu.memory_space<vmem>>, vector<128x2xf32>
    %cst_8 = arith.constant dense<0.000000e+00> : vector<2x2xf32>
    %9 = tpu.matmul %7, %8, %cst_8 {dimension_numbers = #tpu.dot_dimension_numbers<[1], [0], [0], [1], [0, 0, 1, 1], [], []>} : vector<2x128xf32>, vector<128x2xf32>, vector<2x2xf32> -> vector<2x2xf32>
    %c0_9 = arith.constant 0 : index
    %c0_10 = arith.constant 0 : index
    %10 = vector.load %arg5[%c0_9, %c0_10] : memref<1x2xf32, #tpu.memory_space<vmem>>, vector<1x2xf32>
    %11 = vector.broadcast %10 : vector<1x2xf32> to vector<2x2xf32>
    %12 = arith.addf %9, %11 : vector<2x2xf32>
    %c0_11 = arith.constant 0 : index
    %c0_12 = arith.constant 0 : index
    %13 = vector.load %arg6[%c0_11, %c0_12] : memref<2x2xf32, #tpu.memory_space<vmem>>, vector<2x2xf32>
    tpu.vector_store %arg6[%c0_11, %c0_12], %12 {strides = array<i32>} : memref<2x2xf32, #tpu.memory_space<vmem>>, vector<2x2xf32>,
    return
  }
  func.func @transform_0(%arg0: i32) -> (i32, i32) {
    %c0_i32 = arith.constant 0 : i32
    %c0_i32_0 = arith.constant 0 : i32
    return %arg0, %c0_i32 : i32, i32
  }
  func.func @transform_1(%arg0: i32) -> (i32, i32) {
    %c0_i32 = arith.constant 0 : i32
    %c0_i32_0 = arith.constant 0 : i32
    %c0_i32_1 = arith.constant 0 : i32
    return %c0_i32, %c0_i32_0 : i32, i32
  }
  func.func @transform_2(%arg0: i32) -> (i32, i32) {
    %c0_i32 = arith.constant 0 : i32
    %c0_i32_0 = arith.constant 0 : i32
    %c0_i32_1 = arith.constant 0 : i32
    return %c0_i32, %c0_i32_0 : i32, i32
  }
  func.func @transform_3(%arg0: i32) -> (i32, i32) {
    %c0_i32 = arith.constant 0 : i32
    %c0_i32_0 = arith.constant 0 : i32
    %c0_i32_1 = arith.constant 0 : i32
    return %c0_i32, %c0_i32_0 : i32, i32
  }
  func.func @transform_4(%arg0: i32) -> (i32, i32) {
    %c0_i32 = arith.constant 0 : i32
    %c0_i32_0 = arith.constant 0 : i32
    %c0_i32_1 = arith.constant 0 : i32
    return %c0_i32, %c0_i32_0 : i32, i32
  }
  func.func @transform_5(%arg0: i32) -> (i32, i32) {
    %c0_i32 = arith.constant 0 : i32
    %c0_i32_0 = arith.constant 0 : i32
    return %arg0, %c0_i32 : i32, i32
  }
}

</mosaic_0001>

<bundles_post_ra>
// kernel: tpu_custom_call.1
= control target key start
LH: loop header
LB: loop body
LE: loop exit
PB: predicated region body
PF: predicated region fallthrough
CT: control target
= control target key end

     0   :  { %vm31_vm0 = vcmask 1043456   ;;  %vm27_vm1 = vcmask 31744   ;;  %s239_s0 = inlined_call_operand.vmem [shape: f32[2,4], index: 0, kind: input, shape index: {}]   ;;  %s240_s1 = inlined_call_operand.vmem [shape: f32[4,128], index: 1, kind: input, shape index: {}]   ;;  %s241_s2 = inlined_call_operand.vmem [shape: f32[1,128], index: 2, kind: input, shape index: {}]   ;;  %s242_s3 = inlined_call_operand.vmem [shape: f32[128,2], index: 3, kind: input, shape index: {}]   ;;  %s243_s4 = inlined_call_operand.vmem [shape: f32[1,2], index: 4, kind: input, shape index: {}]   ;;  %s244_s5 = inlined_call_operand.hbm [shape: f32[2,2], index: 5, kind: output, shape index: {}]  }
   0x1   :  { %v22_v0 = vld [vmem:[%s240_s1] sm:$0xf]  ;;  %v71_v2 = vld [vmem:[%s242_s3 + $0x78] sm:$0xff]  ;;  %v70_v3 = vld [vmem:[%s242_s3 + $0x70] sm:$0xff] }
   0x2   :  { %v21_v1 = vld [vmem:[%s239_s0] sm:$0x3]  ;;  %114 = vmatpush.msk.msra.mxu0 %vm31_vm0, %v22_v0  ;;  %76 = vmatpush.msra.mxu1 %v71_v2  ;;  %v69_v4 = vld [vmem:[%s242_s3 + $0x68] sm:$0xff] }
   0x3   :  { %115 = vmatmul.msk.f32.vlgmr.msra.gmra.mxu0 %vm27_vm1, %v21_v1  ;;  %v68_v5 = vld [vmem:[%s242_s3 + $0x60] sm:$0xff] }
   0x4   :  { %77 = vmatpush.msra.mxu1 %v70_v3 }
   0x6   :  { %78 = vmatpush.msra.mxu1 %v69_v4 }
   0x7   :  { %10 = vsyncpa [#allocation3], 0  ;;  %v67_v6 = vld [vmem:[%s242_s3 + $0x58] sm:$0xff]  ;;  %v66_v7 = vld [vmem:[%s242_s3 + $0x50] sm:$0xff]  ;;  %s145_s29 = smov [#allocation2]   ;;  %s105_s8 = sshll.u32 %s244_s5, 4  ;;  %s106_s8 = int_to_ptr.hbm [resolvable:$true] %s105_s8 }
   0x8   :  { %79 = vmatpush.msra.mxu1 %v68_v5  ;;  %v65_v8 = vld [vmem:[%s242_s3 + $0x48] sm:$0xff]  ;;  %v64_v9 = vld [vmem:[%s242_s3 + $0x40] sm:$0xff]  ;;  %v63_v10 = vld [vmem:[%s242_s3 + $0x38] sm:$0xff]  ;;  %s103_s30 = sshll.u32 %s145_s29, 4  ;;  %vm96_vm2 = vcmask 9216   ;;  %s104_s30 = int_to_ptr.vmem [resolvable:$true] %s103_s30 }
   0x9   :  { %v62_v11 = vld [vmem:[%s242_s3 + $0x30] sm:$0xff]  ;;  %v61_v12 = vld [vmem:[%s242_s3 + $0x28] sm:$0xff]  ;;  %v60_v13 = vld [vmem:[%s242_s3 + $0x20] sm:$0xff] }
   0xa   :  { %80 = vmatpush.msra.mxu1 %v67_v6  ;;  %v59_v14 = vld [vmem:[%s242_s3 + $0x18] sm:$0xff]  ;;  %v58_v15 = vld [vmem:[%s242_s3 + $0x10] sm:$0xff]  ;;  %v57_v16 = vld [vmem:[%s242_s3 + $0x8] sm:$0xff] }
   0xb   :  { %v56_v17 = vld [vmem:[%s242_s3] sm:$0xff] }
   0xc   :  { %81 = vmatpush.msra.mxu1 %v66_v7  ;;  %v117_v18 = vld [vmem:[%s241_s2] ss:$0 sm:$0xff] }
   0xd   :  { %v118_v22 = vld [vmem:[%s243_s4] ss:$0 sm:$0xff] }
   0xe   :  { %82 = vmatpush.msra.mxu1 %v65_v8 }
  0x10   :  { %83 = vmatpush.msra.mxu1 %v64_v9 }
  0x12   :  { %84 = vmatpush.msra.mxu1 %v63_v10 }
  0x14   :  { %85 = vmatpush.msra.mxu1 %v62_v11 }
  0x16   :  { %86 = vmatpush.msra.mxu1 %v61_v12 }
  0x18   :  { %87 = vmatpush.msra.mxu1 %v60_v13 }
  0x1a   :  { %88 = vmatpush.msra.mxu1 %v59_v14 }
  0x1c   :  { %89 = vmatpush.msra.mxu1 %v58_v15 }
  0x1e   :  { %90 = vmatpush.msra.mxu1 %v57_v16 }
  0x20   :  { %91 = vmatpush.msra.mxu1 %v56_v17 }
  0x80   :  { %v52_v19 = vpop.f32.mrf.mxu0 }
  0x81   :  { %v53_v20 = vadd.f32 %v117_v18, %v52_v19 }
  0x83   :  { %v55_v21 = vmax.f32 %v53_v20, 0.0 }
  0x85   :  { %92 = vmatmul.f32.vlgmr.msra.gmra.mxu1 %v55_v21 }
 0x102   :  { %v93_v23 = vpop.f32.mrf.mxu1 }
 0x103   :  { %v94_v24 = vadd.f32 %v118_v22, %v93_v23 }
 0x105   :  { %97 = vst.msk [vmem:[#allocation2] sm:$0x3] %vm96_vm2, %v94_v24 }
 0x106   :  { %108 = dma.vmem_to_hbm [thread:$0]  %s104_s30, 32, %s106_s8, [#allocation3]  }
 0x107   :  { %143 = dma.done.wait [#allocation3], 32  }
 0x108   :  { %144 = vsyncadd [#allocation3], 4294967264 }
 0x109   :  { %113 = vsyncpa [#allocation3], 1 }

</bundles_post_ra>
